<compile_context>
chip_gen: v6e
topology: v6e:2x2x1
jax: 0.10.0
libtpu: 0.0.40
codegen_flags: <defaults>
</compile_context>

<pallas_src>
import functools

import jax
import jax.numpy as jnp
from jax.experimental import pallas as pl
from jax.experimental.pallas import tpu as pltpu

IN_FEATURES = 20
HIDDEN = 256
OUT_FEATURES = 10
SUBLANE = 8


def _round_up(n, m):
    return ((n + m - 1) // m) * m


def mlp_kernel(x_ref, w1_ref, b1_ref, w2_ref, b2_ref, o_ref):
    # x_ref:  (tb, 20)  f32      w1_ref: (20, 256)  bf16   b1_ref: (1, 256) f32
    # w2_ref: (256, 10) bf16     b2_ref: (1, 10)    f32    o_ref:  (tb, 10) f32
    x = x_ref[...].astype(jnp.bfloat16)          # bf16 MXU inputs, f32 accumulate
    h = jnp.dot(x, w1_ref[...], preferred_element_type=jnp.float32)
    h = jnp.maximum(h + b1_ref[...], 0.0)        # bias + ReLU in f32
    o = jnp.dot(h.astype(jnp.bfloat16), w2_ref[...],
                preferred_element_type=jnp.float32)
    o_ref[...] = (o + b2_ref[...]).astype(o_ref.dtype)


def prepare_params(w1, b1, w2, b2, compute_dtype=jnp.bfloat16):
    """One-time parameter prep (hoisted out of the per-forward path):
    weights cast to bf16 for the MXU, biases kept f32."""
    return (jnp.asarray(w1, compute_dtype), jnp.asarray(b1, jnp.float32),
            jnp.asarray(w2, compute_dtype), jnp.asarray(b2, jnp.float32))


@functools.partial(jax.jit, static_argnames=("block_b",))
def mlp_forward(x, w1, b1, w2, b2, *, block_b=1024):
    """x: (B, 20) f32; w1: (20, 256) bf16; b1: (1, 256) f32;
    w2: (256, 10) bf16; b2: (1, 10) f32.  Returns (B, 10) f32."""
    B = x.shape[0]

    # Batch tile: whole (sublane-rounded) batch when small, else block_b rows.
    # tb is always a multiple of 8; the ragged last tile is masked by Pallas.
    tb = min(block_b, _round_up(B, SUBLANE))
    grid = (pl.cdiv(B, tb),)

    return pl.pallas_call(
        mlp_kernel,
        out_shape=jax.ShapeDtypeStruct((B, OUT_FEATURES), jnp.float32),
        grid=grid,
        in_specs=[
            pl.BlockSpec((tb, IN_FEATURES), lambda i: (i, 0)),       # x: batch-tiled
            pl.BlockSpec((IN_FEATURES, HIDDEN), lambda i: (0, 0)),   # W1: VMEM-resident
            pl.BlockSpec((1, HIDDEN), lambda i: (0, 0)),             # b1: VMEM-resident
            pl.BlockSpec((HIDDEN, OUT_FEATURES), lambda i: (0, 0)),  # W2: VMEM-resident
            pl.BlockSpec((1, OUT_FEATURES), lambda i: (0, 0)),       # b2: VMEM-resident
        ],
        out_specs=pl.BlockSpec((tb, OUT_FEATURES), lambda i: (i, 0)),
        compiler_params=pltpu.CompilerParams(
            dimension_semantics=("parallel",),
        ),
    )(x, w1, b1, w2, b2)


def init_linear_params(key, in_features, out_features, dtype=jnp.float32):
    # Deterministic init mimicking PyTorch nn.Linear default:
    # U(-1/sqrt(fan_in), 1/sqrt(fan_in)); stored as [in, out] for x @ W.
    k_w, k_b = jax.random.split(key)
    bound = 1.0 / jnp.sqrt(jnp.asarray(in_features, dtype))
    w = jax.random.uniform(k_w, (in_features, out_features), dtype, -bound, bound)
    b = jax.random.uniform(k_b, (1, out_features), dtype, -bound, bound)
    return w, b


if __name__ == "__main__":
    key = jax.random.PRNGKey(0)
    k_x, k_l1, k_l2 = jax.random.split(key, 3)

    # Forward implies (batch, 20) input, matching X = torch.randn((2, 20)).
    x = jax.random.normal(k_x, (2, IN_FEATURES), dtype=jnp.float32)

    w1, b1 = init_linear_params(k_l1, IN_FEATURES, HIDDEN)   # nn.Linear(20, 256)
    w2, b2 = init_linear_params(k_l2, OUT_FEATURES * 0 + HIDDEN, OUT_FEATURES)  # nn.Linear(256, 10)

    # One-time weight prep (outside the forward path).
    w1_c, b1_c, w2_c, b2_c = prepare_params(w1, b1, w2, b2)

    out = mlp_forward(x, w1_c, b1_c, w2_c, b2_c)
    out = jax.block_until_ready(out)
    assert out.shape == (2, OUT_FEATURES)

    # bf16-consistent reference (bf16 MXU inputs, f32 accumulation) — tight check.
    h_ref = jnp.maximum(
        jnp.dot(x.astype(jnp.bfloat16), w1_c, preferred_element_type=jnp.float32) + b1, 0.0)
    ref_bf16 = jnp.dot(h_ref.astype(jnp.bfloat16), w2_c,
                       preferred_element_type=jnp.float32) + b2
    assert jnp.allclose(out, ref_bf16, atol=1e-2, rtol=1e-2), \
        float(jnp.max(jnp.abs(out - ref_bf16)))

    # Pure-f32 reference — loose tolerance to absorb bf16 input rounding.
    ref_f32 = jnp.maximum(x @ w1 + b1, 0.0) @ w2 + b2
    assert jnp.allclose(out, ref_f32, atol=5e-2, rtol=5e-2), \
        float(jnp.max(jnp.abs(out - ref_f32)))

    print("KERNEL_OK")
</pallas_src>

<mosaic_0001>
module attributes {stable_mosaic.version = 11 : i64} {
  func.func @mlp_kernel(%arg0: i32, %arg1: memref<8x20xf32, #tpu.memory_space<vmem>>, %arg2: memref<20x256xbf16, #tpu.memory_space<vmem>>, %arg3: memref<1x256xf32, #tpu.memory_space<vmem>>, %arg4: memref<256x10xbf16, #tpu.memory_space<vmem>>, %arg5: memref<1x10xf32, #tpu.memory_space<vmem>>, %arg6: memref<8x10xf32, #tpu.memory_space<vmem>>) attributes {dimension_semantics = [#tpu.dimension_semantics<parallel>], iteration_bounds = array<i64: 1>, scalar_prefetch = 0 : i64, scratch_operands = 0 : i64, tpu.core_type = #tpu.core_type<tc>, window_params = [{transform_indices = @transform_0, window_bounds = array<i64: 8, 20>}, {pipeline_mode = #tpu.pipeline_mode<synchronous>, transform_indices = @transform_1, window_bounds = array<i64: 20, 256>}, {pipeline_mode = #tpu.pipeline_mode<synchronous>, transform_indices = @transform_2, window_bounds = array<i64: 1, 256>}, {pipeline_mode = #tpu.pipeline_mode<synchronous>, transform_indices = @transform_3, window_bounds = array<i64: 256, 10>}, {pipeline_mode = #tpu.pipeline_mode<synchronous>, transform_indices = @transform_4, window_bounds = array<i64: 1, 10>}, {transform_indices = @transform_5, window_bounds = array<i64: 8, 10>}]} {
    %c0 = arith.constant 0 : index
    %c0_0 = arith.constant 0 : index
    %0 = vector.load %arg1[%c0, %c0_0] : memref<8x20xf32, #tpu.memory_space<vmem>>, vector<8x20xf32>
    %1 = arith.truncf %0 : vector<8x20xf32> to vector<8x20xbf16>
    %c0_1 = arith.constant 0 : index
    %c0_2 = arith.constant 0 : index
    %2 = vector.load %arg2[%c0_1, %c0_2] : memref<20x256xbf16, #tpu.memory_space<vmem>>, vector<20x256xbf16>
    %cst = arith.constant dense<0.000000e+00> : vector<8x256xf32>
    %3 = tpu.matmul %1, %2, %cst {dimension_numbers = #tpu.dot_dimension_numbers<[1], [0], [0], [1], [0, 0, 1, 1], [], []>} : vector<8x20xbf16>, vector<20x256xbf16>, vector<8x256xf32> -> vector<8x256xf32>
    %c0_3 = arith.constant 0 : index
    %c0_4 = arith.constant 0 : index
    %4 = vector.load %arg3[%c0_3, %c0_4] : memref<1x256xf32, #tpu.memory_space<vmem>>, vector<1x256xf32>
    %5 = vector.broadcast %4 : vector<1x256xf32> to vector<8x256xf32>
    %6 = arith.addf %3, %5 : vector<8x256xf32>
    %cst_5 = arith.constant 0.000000e+00 : f32
    %7 = vector.broadcast %cst_5 : f32 to vector<8x256xf32>
    %8 = arith.maximumf %6, %7 : vector<8x256xf32>
    %9 = arith.truncf %8 : vector<8x256xf32> to vector<8x256xbf16>
    %c0_6 = arith.constant 0 : index
    %c0_7 = arith.constant 0 : index
    %10 = vector.load %arg4[%c0_6, %c0_7] : memref<256x10xbf16, #tpu.memory_space<vmem>>, vector<256x10xbf16>
    %cst_8 = arith.constant dense<0.000000e+00> : vector<8x10xf32>
    %11 = tpu.matmul %9, %10, %cst_8 {dimension_numbers = #tpu.dot_dimension_numbers<[1], [0], [0], [1], [0, 0, 1, 1], [], []>} : vector<8x256xbf16>, vector<256x10xbf16>, vector<8x10xf32> -> vector<8x10xf32>
    %c0_9 = arith.constant 0 : index
    %c0_10 = arith.constant 0 : index
    %12 = vector.load %arg5[%c0_9, %c0_10] : memref<1x10xf32, #tpu.memory_space<vmem>>, vector<1x10xf32>
    %13 = vector.broadcast %12 : vector<1x10xf32> to vector<8x10xf32>
    %14 = arith.addf %11, %13 : vector<8x10xf32>
    %c0_11 = arith.constant 0 : index
    %c0_12 = arith.constant 0 : index
    %15 = vector.load %arg6[%c0_11, %c0_12] : memref<8x10xf32, #tpu.memory_space<vmem>>, vector<8x10xf32>
    tpu.vector_store %arg6[%c0_11, %c0_12], %14 {strides = array<i32>} : memref<8x10xf32, #tpu.memory_space<vmem>>, vector<8x10xf32>,
    return
  }
  func.func @transform_0(%arg0: i32) -> (i32, i32) {
    %c0_i32 = arith.constant 0 : i32
    %c0_i32_0 = arith.constant 0 : i32
    return %arg0, %c0_i32 : i32, i32
  }
  func.func @transform_1(%arg0: i32) -> (i32, i32) {
    %c0_i32 = arith.constant 0 : i32
    %c0_i32_0 = arith.constant 0 : i32
    %c0_i32_1 = arith.constant 0 : i32
    return %c0_i32, %c0_i32_0 : i32, i32
  }
  func.func @transform_2(%arg0: i32) -> (i32, i32) {
    %c0_i32 = arith.constant 0 : i32
    %c0_i32_0 = arith.constant 0 : i32
    %c0_i32_1 = arith.constant 0 : i32
    return %c0_i32, %c0_i32_0 : i32, i32
  }
  func.func @transform_3(%arg0: i32) -> (i32, i32) {
    %c0_i32 = arith.constant 0 : i32
    %c0_i32_0 = arith.constant 0 : i32
    %c0_i32_1 = arith.constant 0 : i32
    return %c0_i32, %c0_i32_0 : i32, i32
  }
  func.func @transform_4(%arg0: i32) -> (i32, i32) {
    %c0_i32 = arith.constant 0 : i32
    %c0_i32_0 = arith.constant 0 : i32
    %c0_i32_1 = arith.constant 0 : i32
    return %c0_i32, %c0_i32_0 : i32, i32
  }
  func.func @transform_5(%arg0: i32) -> (i32, i32) {
    %c0_i32 = arith.constant 0 : i32
    %c0_i32_0 = arith.constant 0 : i32
    return %arg0, %c0_i32 : i32, i32
  }
}

</mosaic_0001>

<bundles_post_ra>
// kernel: mlp_forward.1
= control target key start
LH: loop header
LB: loop body
LE: loop exit
PB: predicated region body
PF: predicated region fallthrough
CT: control target
= control target key end

     0   :  { %10 = vsyncpa [#allocation3], 0  ;;  %vm58_vm0 = vcmask 1041408   ;;  %v395_v5 = vmov 0   ;;  %vm54_vm1 = vcmask 162816   ;;  %v29_v25 = vlaneseq  ;;  %s498_s0 = inlined_call_operand.vmem [shape: f32[2,20], index: 0, kind: input, shape index: {}]   ;;  %s499_s1 = inlined_call_operand.vmem [shape: bf16[20,256], index: 1, kind: input, shape index: {}]   ;;  %s500_s2 = inlined_call_operand.vmem [shape: f32[1,256], index: 2, kind: input, shape index: {}]   ;;  %s501_s3 = inlined_call_operand.vmem [shape: bf16[256,10], index: 3, kind: input, shape index: {}]   ;;  %s502_s4 = inlined_call_operand.vmem [shape: f32[1,10], index: 4, kind: input, shape index: {}]   ;;  %s503_s5 = inlined_call_operand.hbm [shape: f32[2,10], index: 5, kind: output, shape index: {}]  }
   0x1   :  { %v26_v0 = vld [vmem:[%s499_s1 + $0x10] sm:$0x33]  ;;  %v354_v3 = vld [vmem:[%s499_s1 + $0x4] ss:$8 sps:$4 sm:$0xff]   ;;  %v356_v4 = vld [vmem:[%s499_s1] ss:$8 sps:$4 sm:$0xff]   ;;  %97 = vmatprep.mubr.bf16.mxu0 %v395_v5 }
   0x2   :  { %v306_v1 = vcombine.high %v26_v0, %v26_v0  ;;  %v305_v2 = vcombine.low %v26_v0, %v26_v0  ;;  %v22_v6 = vld [vmem:[%s498_s0] sm:$0xff]  ;;  %v357_v8 = vld [vmem:[%s501_s3 + $0x78] sm:$0xff]   ;;  %v359_v10 = vld [vmem:[%s501_s3 + $0x70] sm:$0xff]   ;;  %v30_v26 = vshrl.u32 %v29_v25, 7  ;;  %vm285_vm2 = vcmask 80896  }
   0x3   :  { %v358_v9 = vld [vmem:[%s501_s3 + $0x38] sm:$0xff]   ;;  %326 = vmatprep.subr.bf16.mxu1 %v357_v8  ;;  %v360_v11 = vld [vmem:[%s501_s3 + $0x30] sm:$0xff]   ;;  %v23_v12 = vpack.c.bf16 %v22_v6, %v22_v6  ;;  %v361_v13 = vld [vmem:[%s501_s3 + $0x68] sm:$0xff]  }
   0x4   :  { %307 = vmatprep.subr.msk.bf16.mxu0 %vm58_vm0, %v306_v1  ;;  %v60_v7 = vsel %vm58_vm0, %v305_v2, 0  ;;  %327 = vmatpush3.bf16.msra.mxu1 %v358_v9  ;;  %v362_v14 = vld [vmem:[%s501_s3 + $0x28] sm:$0xff]   ;;  %v363_v15 = vld [vmem:[%s501_s3 + $0x60] sm:$0xff]   ;;  %v365_v17 = vld [vmem:[%s501_s3 + $0x58] sm:$0xff]   ;;  %v31_v27 = vsub.s32 0, %v30_v26  ;;  %v35_v29 = vsub.s32 1, %v30_v26 }
   0x5   :  { %78 = vmatpush1.bf16.msra.mxu0 %v60_v7  ;;  %328 = vmatprep.subr.bf16.mxu1 %v359_v10  ;;  %v364_v16 = vld [vmem:[%s501_s3 + $0x20] sm:$0xff]   ;;  %v366_v18 = vld [vmem:[%s501_s3 + $0x18] sm:$0xff]   ;;  %v367_v19 = vld [vmem:[%s501_s3 + $0x50] sm:$0xff]  }
   0x6   :  { %79 = vmatprep.subr.bf16.mxu0 %v354_v3  ;;  %v368_v20 = vld [vmem:[%s501_s3 + $0x10] sm:$0xff]   ;;  %v369_v21 = vld [vmem:[%s501_s3 + $0x48] sm:$0xff]   ;;  %v371_v23 = vld [vmem:[%s501_s3 + $0x40] sm:$0xff]  }
   0x7   :  { %v370_v22 = vld [vmem:[%s501_s3 + $0x8] sm:$0xff]   ;;  %v372_v24 = vld [vmem:[%s501_s3] sm:$0xff]  }
   0x8   :  { %329 = vmatpush3.bf16.msra.mxu1 %v360_v11  ;;  %v27_v28 = vld [vmem:[%s500_s2] sm:$0x3] }
   0x9   :  { %80 = vmatpush1.bf16.msra.mxu0 %v356_v4  ;;  %330 = vmatprep.subr.bf16.mxu1 %v361_v13  ;;  %v32_v30 = vrot.slane %v27_v28, %v31_v27  ;;  %v36_v31 = vrot.slane %v27_v28, %v35_v29  ;;  %v309_v43 = vld [vmem:[%s502_s4] ss:$0 sm:$0xff] }
   0xc   :  { %308 = vmatmul.mubr.msk.bf16.vlgmr.msra.gmra.mxu0 %vm54_vm1, %v23_v12  ;;  %331 = vmatpush3.bf16.msra.mxu1 %v362_v14 }
   0xd   :  { %332 = vmatprep.subr.bf16.mxu1 %v363_v15 }
  0x10   :  { %333 = vmatpush3.bf16.msra.mxu1 %v364_v16 }
  0x11   :  { %334 = vmatprep.subr.bf16.mxu1 %v365_v17 }
  0x14   :  { %335 = vmatpush3.bf16.msra.mxu1 %v366_v18 }
  0x15   :  { %336 = vmatprep.subr.bf16.mxu1 %v367_v19 }
  0x18   :  { %337 = vmatpush3.bf16.msra.mxu1 %v368_v20 }
  0x19   :  { %338 = vmatprep.subr.bf16.mxu1 %v369_v21 }
  0x1c   :  { %339 = vmatpush3.bf16.msra.mxu1 %v370_v22 }
  0x1d   :  { %340 = vmatprep.subr.bf16.mxu1 %v371_v23 }
  0x20   :  { %341 = vmatpush3.bf16.msra.mxu1 %v372_v24 }
  0xcc   :  { %v99_v32 = vpop.f32.mrf.mxu0 }
  0xcd   :  { %v100_v33 = vadd.f32 %v99_v32, %v32_v30 }
  0xce   :  { %v101_v34 = vpop.f32.mrf.mxu0 }
  0xcf   :  { %v102_v35 = vadd.f32 %v101_v34, %v36_v31  ;;  %v106_v36 = vmax.f32 %v100_v33, 0.0 }
  0xd0   :  { %v103_v37 = vpop.f32.mrf.mxu0 }
  0xd1   :  { %v107_v38 = vmax.f32 %v102_v35, 0.0  ;;  %v108_v41 = vpack.c.bf16 %v106_v36, %v106_v36 }
  0xd2   :  { %v104_v39 = vpop.f32.mrf.mxu0 }
  0xd3   :  { %v109_v40 = vpack.c.bf16 %v107_v38, %v107_v38 }
  0xd5   :  { %277 = vmatprep.mubr.bf16.mxu1 %v109_v40 }
  0xd6   :  { %278 = vmatmul.mubr.bf16.vlgmr.msra.gmra.mxu1 %v108_v41 }
 0x196   :  { %v342_v42 = vpop.f32.mrf.mxu1 }
 0x198   :  { %v343_v44 = vpop.f32.mrf.mxu1 }
 0x199   :  { %v344_v45 = vadd.f32 %v343_v44, %v342_v42 }
 0x19a   :  { %v345_v46 = vpop.f32.mrf.mxu1 }
 0x19b   :  { %v280_v47 = vadd.f32 %v344_v45, %v309_v43 }
 0x19c   :  { %v346_v48 = vpop.f32.mrf.mxu1 }
 0x19d   :  { %286 = vst.msk [vmem:[#allocation2] sm:$0xff] %vm285_vm2, %v280_v47 }
 0x19e   :  { %291 = vsyncadd [#allocation3], 96  ;;  %s396_s2 = smov [#allocation2]  }
 0x19f   :  { %s292_s7 = sshll.u32 %s396_s2, 4  ;;  %s293_s7 = int_to_ptr.vmem [resolvable:$true] %s292_s7 }
 0x1a0   :  { %s373_s8 = scalar_lea.vmem %s293_s7, 32  ;;  %s377_s9 = scalar_lea.vmem %s293_s7, 128 }
 0x1a1   :  { %p374_p0 = scmp.ne.s32.totalorder %s293_s7, %s373_s8  ;;  %p378_p1 = scmp.lt.s32.totalorder %s293_s7, %s293_s7 }
 0x1a2   :  { %p379_p2 = scmp.lt.s32.totalorder %s377_s9, %s373_s8 }
 0x1a4   :  { %p380_p3 = por %p379_p2, %p378_p1 }
 0x1a6   :  { %p381_p4 = pnand %p380_p3, %p374_p0 }
 0x1a8   :  { %384 = shalt.err (!%p381_p4)
}
 0x1a9   :  { %s397_s4 = smov 32   ;;  %s398_s10 = smov 2  }
 0x1aa   :  { %298 = dma.vmem_to_hbm [thread:$0]  %s293_s7, 32, %s503_s5, [#allocation3], %s397_s4, %s397_s4, %s398_s10  }
 0x1ab   :  { %393 = dma.done.wait [#allocation3], 128  }
 0x1ac   :  { %394 = vsyncadd [#allocation3], 4294967168 }
 0x1ad   :  { %302 = vsyncpa [#allocation3], 1 }

</bundles_post_ra>
